<compile_context>
chip_gen: v7x
topology: tpu7x:2x2x1
jax: 0.10.0
libtpu: 0.0.40
codegen_flags: <defaults>
</compile_context>

<pallas_src>
import functools
import math

import jax
import jax.numpy as jnp
from jax.experimental import pallas as pl
from jax.experimental.pallas import tpu as pltpu


# Deterministic module configuration (mirrors MultiActivation.__init__ with
# activations = [(8, nn.ReLU()), (8, nn.Tanh()), (16, nn.Sigmoid())]).
ACTIVATIONS = [(8, "relu"), (8, "tanh"), (16, "sigmoid")]


def _build_segments(activations):
    """Compute (start_index, length, act_name) like the PyTorch __init__."""
    segments = []
    start = 0
    for length, name in activations:
        segments.append((start, length, name))
        start += length
    return tuple(segments), start  # segments, total feature width


def _apply_act(name, x):
    if name == "relu":
        return jnp.maximum(x, 0.0)
    if name == "tanh":
        return jnp.tanh(x)
    if name == "sigmoid":
        return jax.nn.sigmoid(x)
    if name == "identity":
        return x
    raise ValueError(f"unsupported activation: {name}")


def _or_all(masks):
    m = masks[0]
    for mm in masks[1:]:
        m = m | mm
    return m


def _multi_activation_kernel(x_ref, o_ref, *, segments, period):
    """x_ref / o_ref: (tr, width) VMEM tiles, width a multiple of 128.

    `fold = width // period` logical feature vectors live side-by-side in one
    lane row; the segment/activation pattern repeats with period `period`
    along the lane axis, so lane classification is `lane % period`.
    """
    x = x_ref[...].astype(jnp.float32)  # f32 compute path (v5e bf16 note)
    lane = jax.lax.broadcasted_iota(jnp.int32, x.shape, x.ndim - 1) % period

    def seg_mask(start, length):
        return (lane >= start) & (lane < start + length)

    relu_masks = [seg_mask(s, l) for s, l, n in segments if n == "relu"]
    tanh_masks = [seg_mask(s, l) for s, l, n in segments if n == "tanh"]
    sig_masks = [seg_mask(s, l) for s, l, n in segments if n == "sigmoid"]
    # (identity segments, if any, fall through to the default `y = x`)

    y = x
    if relu_masks:
        y = jnp.where(_or_all(relu_masks), jnp.maximum(x, 0.0), y)
    if tanh_masks or sig_masks:
        # One transcendental per element: tanh(x) for tanh lanes,
        # tanh(x/2) for sigmoid lanes, then affine fixup on the VPU.
        sig_mask = _or_all(sig_masks) if sig_masks else None
        scale = jnp.where(sig_mask, 0.5, 1.0) if sig_mask is not None else 1.0
        t = jnp.tanh(x * scale)
        if tanh_masks:
            y = jnp.where(_or_all(tanh_masks), t, y)
        if sig_masks:
            y = jnp.where(sig_mask, 0.5 * t + 0.5, y)

    # One dense, full-lane-width store per tile.
    o_ref[...] = y.astype(o_ref.dtype)


def _sublane_packing(dtype):
    itemsize = jnp.dtype(dtype).itemsize
    return max(8, 32 // max(itemsize, 1))  # 8 f32, 16 bf16, 32 int8/fp8


def multi_activation(x, activations=ACTIVATIONS, *, target_block_bytes=2 << 20):
    """Pallas-backed MultiActivation forward.

    x: any shape (..., F) where F == sum(lengths in `activations`).
    """
    segments, total_f = _build_segments(activations)
    assert x.shape[-1] == total_f, (x.shape, total_f)

    orig_shape = x.shape
    dtype = x.dtype
    itemsize = jnp.dtype(dtype).itemsize
    n = math.prod(orig_shape[:-1]) if len(orig_shape) > 1 else 1
    x2 = x.reshape(n, total_f)

    # Fold rows so the lane axis is a multiple of 128 (lane-dense stores).
    fold = math.lcm(total_f, 128) // total_f
    width = total_f * fold

    # Pad only the tiny fold remainder (< fold rows), if any.
    n_pad = -(-n // fold) * fold
    if n_pad != n:
        x2 = jnp.pad(x2, ((0, n_pad - n), (0, 0)))
    rows = n_pad // fold
    xf = x2.reshape(rows, width)

    # Tile rows: target ~target_block_bytes per block, multiple of the
    # sublane packing, and never (much) larger than the array itself.
    sub = _sublane_packing(dtype)
    tr = max(sub, (target_block_bytes // (width * itemsize)) // sub * sub)
    tr = min(tr, -(-rows // sub) * sub)

    grid = (pl.cdiv(rows, tr),)  # Pallas pads the last block if needed.

    kernel = functools.partial(
        _multi_activation_kernel, segments=segments, period=total_f)

    outf = pl.pallas_call(
        kernel,
        out_shape=jax.ShapeDtypeStruct((rows, width), dtype),
        grid=grid,
        in_specs=[pl.BlockSpec((tr, width), lambda i: (i, 0))],
        out_specs=pl.BlockSpec((tr, width), lambda i: (i, 0)),
        compiler_params=pltpu.CompilerParams(
            dimension_semantics=("parallel",)),
    )(xf)

    out2 = outf.reshape(n_pad, total_f)
    if n_pad != n:
        out2 = out2[:n]
    return out2.reshape(orig_shape)


def multi_activation_ref(x, activations=ACTIVATIONS):
    """Pure-JAX reference mirroring the PyTorch forward."""
    segments, _ = _build_segments(activations)
    outs = [_apply_act(name, x[..., s:s + l]) for s, l, name in segments]
    return jnp.concatenate(outs, axis=-1)


if __name__ == "__main__":
    key = jax.random.PRNGKey(0)
    # Small NCHW-like tensor whose last dim (32) equals sum of segment lengths.
    x = jax.random.normal(key, (2, 4, 16, 32), dtype=jnp.float32)

    out = multi_activation(x)
    out = jax.block_until_ready(out)

    ref = multi_activation_ref(x)
    assert out.shape == x.shape
    assert jnp.allclose(out, ref, atol=1e-5, rtol=1e-5), "mismatch vs reference"

    # Also exercise a row count that is not divisible by the lane-fold factor.
    x_odd = jax.random.normal(key, (3, 7, 32), dtype=jnp.float32)
    out_odd = jax.block_until_ready(multi_activation(x_odd))
    assert jnp.allclose(out_odd, multi_activation_ref(x_odd),
                        atol=1e-5, rtol=1e-5), "mismatch vs reference (odd rows)"

    print("KERNEL_OK")
</pallas_src>

<mosaic_0001>
module attributes {stable_mosaic.version = 11 : i64} {
  func.func @_multi_activation_kernel(%arg0: i32, %arg1: memref<32x128xf32, #tpu.memory_space<vmem>>, %arg2: memref<32x128xf32, #tpu.memory_space<vmem>>) attributes {dimension_semantics = [#tpu.dimension_semantics<parallel>], iteration_bounds = array<i64: 1>, scalar_prefetch = 0 : i64, scratch_operands = 0 : i64, tpu.core_type = #tpu.core_type<tc>, window_params = [{transform_indices = @transform_0, window_bounds = array<i64: 32, 128>}, {transform_indices = @transform_1, window_bounds = array<i64: 32, 128>}]} {
    %c0 = arith.constant 0 : index
    %c0_0 = arith.constant 0 : index
    %0 = vector.load %arg1[%c0, %c0_0] : memref<32x128xf32, #tpu.memory_space<vmem>>, vector<32x128xf32>
    %1 = tpu.iota {dimensions = array<i32: 1>} : vector<32x128xi32>
    %c32_i32 = arith.constant 32 : i32
    %c0_i32 = arith.constant 0 : i32
    %2 = arith.cmpi eq, %c32_i32, %c0_i32 : i32
    %c1_i32 = arith.constant 1 : i32
    %3 = arith.select %2, %c1_i32, %c32_i32 : i32
    %4 = vector.broadcast %3 : i32 to vector<32x128xi32>
    %5 = arith.remsi %1, %4 : vector<32x128xi32>
    %c0_i32_1 = arith.constant 0 : i32
    %6 = vector.broadcast %c0_i32_1 : i32 to vector<32x128xi32>
    %7 = arith.cmpi ne, %5, %6 : vector<32x128xi32>
    %c0_i32_2 = arith.constant 0 : i32
    %8 = vector.broadcast %c0_i32_2 : i32 to vector<32x128xi32>
    %9 = arith.cmpi slt, %5, %8 : vector<32x128xi32>
    %c0_i32_3 = arith.constant 0 : i32
    %10 = arith.cmpi slt, %3, %c0_i32_3 : i32
    %11 = vector.broadcast %10 : i1 to vector<32x128xi1>
    %12 = vector.broadcast %11 : vector<32x128xi1> to vector<32x128xi1>
    %13 = arith.xori %9, %12 : vector<32x128xi1>
    %14 = arith.andi %13, %7 : vector<32x128xi1>
    %15 = vector.broadcast %3 : i32 to vector<32x128xi32>
    %16 = arith.addi %5, %15 : vector<32x128xi32>
    %17 = arith.select %14, %16, %5 : vector<32x128xi1>, vector<32x128xi32>
    %c0_i32_4 = arith.constant 0 : i32
    %18 = vector.broadcast %c0_i32_4 : i32 to vector<32x128xi32>
    %19 = arith.cmpi sge, %17, %18 : vector<32x128xi32>
    %c8_i32 = arith.constant 8 : i32
    %20 = vector.broadcast %c8_i32 : i32 to vector<32x128xi32>
    %21 = arith.cmpi slt, %17, %20 : vector<32x128xi32>
    %22 = arith.andi %19, %21 : vector<32x128xi1>
    %c8_i32_5 = arith.constant 8 : i32
    %23 = vector.broadcast %c8_i32_5 : i32 to vector<32x128xi32>
    %24 = arith.cmpi sge, %17, %23 : vector<32x128xi32>
    %c16_i32 = arith.constant 16 : i32
    %25 = vector.broadcast %c16_i32 : i32 to vector<32x128xi32>
    %26 = arith.cmpi slt, %17, %25 : vector<32x128xi32>
    %27 = arith.andi %24, %26 : vector<32x128xi1>
    %c16_i32_6 = arith.constant 16 : i32
    %28 = vector.broadcast %c16_i32_6 : i32 to vector<32x128xi32>
    %29 = arith.cmpi sge, %17, %28 : vector<32x128xi32>
    %c32_i32_7 = arith.constant 32 : i32
    %30 = vector.broadcast %c32_i32_7 : i32 to vector<32x128xi32>
    %31 = arith.cmpi slt, %17, %30 : vector<32x128xi32>
    %32 = arith.andi %29, %31 : vector<32x128xi1>
    %cst = arith.constant 0.000000e+00 : f32
    %33 = vector.broadcast %cst : f32 to vector<32x128xf32>
    %34 = arith.maximumf %0, %33 : vector<32x128xf32>
    %35 = arith.select %22, %34, %0 : vector<32x128xi1>, vector<32x128xf32>
    %cst_8 = arith.constant 5.000000e-01 : f32
    %cst_9 = arith.constant 1.000000e+00 : f32
    %36 = vector.broadcast %cst_8 : f32 to vector<32x128xf32>
    %37 = vector.broadcast %cst_9 : f32 to vector<32x128xf32>
    %38 = arith.select %32, %36, %37 : vector<32x128xi1>, vector<32x128xf32>
    %39 = arith.mulf %0, %38 : vector<32x128xf32>
    %40 = math.tanh %39 : vector<32x128xf32>
    %41 = arith.select %27, %40, %35 : vector<32x128xi1>, vector<32x128xf32>
    %cst_10 = arith.constant 5.000000e-01 : f32
    %42 = vector.broadcast %cst_10 : f32 to vector<32x128xf32>
    %43 = arith.mulf %42, %40 : vector<32x128xf32>
    %cst_11 = arith.constant 5.000000e-01 : f32
    %44 = vector.broadcast %cst_11 : f32 to vector<32x128xf32>
    %45 = arith.addf %43, %44 : vector<32x128xf32>
    %46 = arith.select %32, %45, %41 : vector<32x128xi1>, vector<32x128xf32>
    %c0_12 = arith.constant 0 : index
    %c0_13 = arith.constant 0 : index
    %47 = vector.load %arg2[%c0_12, %c0_13] : memref<32x128xf32, #tpu.memory_space<vmem>>, vector<32x128xf32>
    tpu.vector_store %arg2[%c0_12, %c0_13], %46 {strides = array<i32>} : memref<32x128xf32, #tpu.memory_space<vmem>>, vector<32x128xf32>,
    return
  }
  func.func @transform_0(%arg0: i32) -> (i32, i32) {
    %c0_i32 = arith.constant 0 : i32
    %c0_i32_0 = arith.constant 0 : i32
    return %arg0, %c0_i32 : i32, i32
  }
  func.func @transform_1(%arg0: i32) -> (i32, i32) {
    %c0_i32 = arith.constant 0 : i32
    %c0_i32_0 = arith.constant 0 : i32
    return %arg0, %c0_i32 : i32, i32
  }
}

</mosaic_0001>

<bundles_post_ra>
// kernel: tpu_custom_call.1
= control target key start
LH: loop header
LB: loop body
LE: loop exit
PB: predicated region body
PF: predicated region fallthrough
CT: control target
= control target key end

     0   :  { %6 = vsyncpa [#allocation3], 0  ;;  %s231_s0 = inlined_call_operand.hbm [shape: f32[32,128], index: 0, kind: input, shape index: {}]   ;;  %s232_s1 = inlined_call_operand.hbm [shape: f32[32,128], index: 1, kind: output, shape index: {}]  }
   0x1   :  { %7 = vsyncpa [#allocation4], 0  ;;  %s165_s6 = smov [#allocation2]   ;;  %s117_s10 = scalar_lea.hbm %s231_s0, 512 }
   0x2   :  { %s13_s7 = sshll.u32 %s165_s6, 4  ;;  %p118_p0 = scmp.ne.s32.totalorder %s231_s0, %s117_s10  ;;  %s14_s7 = int_to_ptr.vmem [resolvable:$true] %s13_s7 }
   0x3   :  { %p121_p1 = scmp.lt.u32.totalorder %s117_s10, %s231_s0 }
   0x5   :  { %p123_p2 = pnand %p121_p1, %p118_p0 }
   0x7   :  { %126 = shalt.err (!%p123_p2)
}
   0x8   :  { %s127_s15 = scalar_lea.vmem %s14_s7, 512  ;;  %p132_p4 = scmp.lt.s32.totalorder %s14_s7, %s14_s7 }
   0x9   :  { %p128_p3 = scmp.ne.s32.totalorder %s14_s7, %s127_s15  ;;  %p133_p5 = scmp.lt.s32.totalorder %s127_s15, %s127_s15 }
   0xb   :  { %p134_p6 = por %p133_p5, %p132_p4 }
   0xd   :  { %p135_p7 = pnand %p134_p6, %p128_p3 }
   0xf   :  { %138 = shalt.err (!%p135_p7)
}
  0x10   :  { %s166_s16 = smov 128   ;;  %s167_s17 = smov 8  }
  0x11   :  { %19 = dma.hbm_to_vmem [thread:$0]  %s231_s0, 512, %s14_s7, [#allocation3], %s166_s16, %s166_s16, %s167_s17  }
  0x12   :  { %161 = dma.done.wait [#allocation3], 512  }
  0x13   :  { %162 = vsyncadd [#allocation3], 4294966784  ;;  %v27_v0 = vlaneseq  ;;  %v23_v3 = vld [vmem:[#allocation2] sm:$0xff]  ;;  %v168_v4 = vmov 1.0   ;;  %v24_v6 = vld [vmem:[#allocation2 + $0x8] sm:$0xff]  ;;  %s169_s0 = smov [#allocation5]  }
  0x14   :  { %v25_v9 = vld [vmem:[#allocation2 + $0x10] sm:$0xff]  ;;  %v26_v10 = vld [vmem:[#allocation2 + $0x18] sm:$0xff]  ;;  %v50_v13 = vmax.f32 %v23_v3, 0.0  ;;  %v51_v14 = vmax.f32 %v24_v6, 0.0  ;;  %s92_s20 = sshll.u32 %s169_s0, 4  ;;  %s93_s20 = int_to_ptr.vmem [resolvable:$true] %s92_s20 }
  0x15   :  { %v28_v1 = vand.u32 127, %v27_v0  ;;  %v52_v15 = vmax.f32 %v25_v9, 0.0  ;;  %v53_v16 = vmax.f32 %v26_v10, 0.0  ;;  %s139_s21 = scalar_lea.vmem %s93_s20, 512  ;;  %p144_p9 = scmp.lt.s32.totalorder %s93_s20, %s93_s20 }
  0x16   :  { %p140_p8 = scmp.ne.s32.totalorder %s93_s20, %s139_s21  ;;  %p145_p10 = scmp.lt.s32.totalorder %s139_s21, %s139_s21 }
  0x17   :  { %v33_v2 = vand.u32 31, %v28_v1 }
  0x18   :  { %p146_p11 = por %p145_p10, %p144_p9 }
  0x19   :  { %vm47_vm0 = vcmp.ge.s32.totalorder %v33_v2, 16  ;;  %vm42_vm1 = vcmp.lt.s32.totalorder %v33_v2, 8  ;;  %vm44_vm2 = vcmp.ge.s32.totalorder %v33_v2, 8  ;;  %vm45_vm3 = vcmp.lt.s32.totalorder %v33_v2, 16 }
  0x1a   :  { %v58_v5 = vsel %vm47_vm0, 0.5, %v168_v4  ;;  %vm196_vm4 = vmand %vm44_vm2, %vm45_vm3  ;;  %v54_v18 = vsel %vm42_vm1, %v50_v13, %v23_v3  ;;  %v55_v20 = vsel %vm42_vm1, %v51_v14, %v24_v6  ;;  %v56_v23 = vsel %vm42_vm1, %v52_v15, %v25_v9  ;;  %p147_p12 = pnand %p146_p11, %p140_p8 }
  0x1b   :  { %v59_v7 = vmul.f32 %v58_v5, %v23_v3  ;;  %v60_v8 = vmul.f32 %v58_v5, %v24_v6  ;;  %v61_v11 = vmul.f32 %v58_v5, %v25_v9  ;;  %v62_v12 = vmul.f32 %v58_v5, %v26_v10 }
  0x1c   :  { %v57_v27 = vsel %vm42_vm1, %v53_v16, %v26_v10 }
  0x1d   :  { %109 = vtanh.f32 %v59_v7 }
  0x1e   :  { %111 = vtanh.f32 %v60_v8 }
  0x1f   :  { %113 = vtanh.f32 %v61_v11 }
  0x20   :  { %115 = vtanh.f32 %v62_v12 }
  0x27   :  { %v110_v19 = vpop.eup %109 }
  0x28   :  { %v112_v21 = vpop.eup %111  ;;  %v71_v22 = vmul.f32 0.5, %v110_v19  ;;  %v67_v25 = vsel %vm196_vm4, %v110_v19, %v54_v18 }
  0x29   :  { %v114_v24 = vpop.eup %113  ;;  %v72_v26 = vmul.f32 0.5, %v112_v21  ;;  %v68_v30 = vsel %vm196_vm4, %v112_v21, %v55_v20 }
  0x2a   :  { %v116_v28 = vpop.eup %115  ;;  %v75_v29 = vadd.f32 0.5, %v71_v22  ;;  %v73_v31 = vmul.f32 0.5, %v114_v24  ;;  %v69_v33 = vsel %vm196_vm4, %v114_v24, %v56_v23 }
  0x2b   :  { %v76_v32 = vadd.f32 0.5, %v72_v26  ;;  %v74_v34 = vmul.f32 0.5, %v116_v28  ;;  %v70_v37 = vsel %vm196_vm4, %v116_v28, %v57_v27 }
  0x2c   :  { %v79_v35 = vsel %vm47_vm0, %v75_v29, %v67_v25  ;;  %v77_v36 = vadd.f32 0.5, %v73_v31 }
  0x2d   :  { %83 = vst [vmem:[#allocation5] sm:$0xff] %v79_v35  ;;  %v80_v38 = vsel %vm47_vm0, %v76_v32, %v68_v30  ;;  %v78_v39 = vadd.f32 0.5, %v74_v34 }
  0x2e   :  { %84 = vst [vmem:[#allocation5 + $0x8] sm:$0xff] %v80_v38  ;;  %v81_v40 = vsel %vm47_vm0, %v77_v36, %v69_v33 }
  0x2f   :  { %85 = vst [vmem:[#allocation5 + $0x10] sm:$0xff] %v81_v40  ;;  %v82_v41 = vsel %vm47_vm0, %v78_v39, %v70_v37 }
  0x30   :  { %86 = vst [vmem:[#allocation5 + $0x18] sm:$0xff] %v82_v41 }
  0x31   :  { %150 = shalt.err (!%p147_p12)
}
  0x32   :  { %s151_s24 = scalar_lea.hbm %s232_s1, 512 }
  0x33   :  { %p152_p13 = scmp.ne.s32.totalorder %s232_s1, %s151_s24  ;;  %p155_p0 = scmp.lt.u32.totalorder %s151_s24, %s232_s1 }
  0x35   :  { %p157_p1 = pnand %p155_p0, %p152_p13 }
  0x37   :  { %160 = shalt.err (!%p157_p1)
}
  0x38   :  { %98 = dma.vmem_to_hbm [thread:$0]  %s93_s20, 512, %s232_s1, [#allocation4], %s166_s16, %s166_s16, %s167_s17  }
  0x39   :  { %163 = dma.done.wait [#allocation4], 512  }
  0x3a   :  { %164 = vsyncadd [#allocation4], 4294966784 }
  0x3b   :  { %102 = vsyncpa [#allocation3], 1 }
  0x3c   :  { %103 = vsyncpa [#allocation4], 1 }

</bundles_post_ra>
